<compile_context>
chip_gen: v5e
topology: v5e:2x2
jax: 0.10.0
libtpu: 0.0.40
codegen_flags: <defaults>
</compile_context>

<pallas_src>
import jax
import jax.numpy as jnp
from jax.experimental import pallas as pl
from jax.experimental.pallas import tpu as pltpu


_LANE = 128


def _round_down_lane(v):
    return (v // _LANE) * _LANE


def _round_up_lane(v):
    return ((v + _LANE - 1) // _LANE) * _LANE


def _pointconv_relu_kernel(x_ref, w_ref, b_ref, o_ref):
    # x_ref: (C_in, TL), w_ref: (C_out, C_in), b_ref: (C_out, 1), o_ref: (C_out, TL)
    y = jnp.dot(w_ref[...], x_ref[...], preferred_element_type=jnp.float32)
    y = y + b_ref[...]                      # bias broadcast over the lane axis
    o_ref[...] = jnp.maximum(y, 0.0).astype(o_ref.dtype)


def _choose_length_tile(length, c_in, c_out, n, dtype_bytes):
    """Pick the length tile (lane axis of the x / out blocks)."""
    if length <= _LANE:
        # Full-extent (small) block: satisfies the (8,128) rule by equaling the dim.
        return length
    # Fill ~24 MiB with the two double-buffered tiles (2 bufs x (x + out) tile).
    tile_budget = 24 * 1024 * 1024
    per_lane = 2 * (c_in + c_out) * dtype_bytes
    tl = max(_LANE, _round_down_lane(tile_budget // per_lane))
    # Keep >=2 steps on a 'parallel' axis so v7x's two TensorCores both get work.
    if n == 1:
        tl = min(tl, max(_LANE, _round_down_lane(pl.cdiv(length, 2))))
    # Never larger than the lane-rounded length.
    tl = min(tl, _round_up_lane(length))
    return tl


def point_conv_layer(x_ncl, weight, bias, *, use_bf16_inputs=False):
    """Conv1d(kernel_size=1) + ReLU, computed in NCL layout.

    x_ncl:  (N, C_in, L)   float32   (PyTorch NCL layout)
    weight: (C_out, C_in)  float32   (kernel_size=1 squeezed)
    bias:   (C_out,)       float32
    returns (N, C_out, L)  same dtype as (possibly bf16-cast) x
    """
    n, c_in, length = x_ncl.shape
    c_out = weight.shape[0]

    if use_bf16_inputs:
        # Halves the dominant HBM traffic; dot still accumulates in f32.
        # Results differ slightly from the f32 PyTorch reference.
        x_ncl = x_ncl.astype(jnp.bfloat16)
        weight = weight.astype(jnp.bfloat16)

    dtype_bytes = jnp.dtype(x_ncl.dtype).itemsize
    tl = _choose_length_tile(length, c_in, c_out, n, dtype_bytes)
    grid = (n, pl.cdiv(length, tl))

    b2d = bias.astype(jnp.float32).reshape(c_out, 1)

    # VMEM budget: 2-deep pipeline buffers for x+out tiles + resident weight/bias + slack.
    tile_bytes = 2 * (c_in + c_out) * tl * dtype_bytes
    resident_bytes = weight.size * jnp.dtype(weight.dtype).itemsize + b2d.size * 4
    vmem_limit = tile_bytes + resident_bytes + (4 << 20)
    vmem_limit = max(16 << 20, min(vmem_limit, 48 << 20))

    # Scheduler hint uses the true length (no padding anywhere).
    flops = 2 * n * length * c_in * c_out
    bytes_accessed = (
        n * length * c_in * dtype_bytes          # x read
        + c_in * c_out * dtype_bytes + c_out * 4  # weight + bias
        + n * length * c_out * dtype_bytes        # out write
    )

    out = pl.pallas_call(
        _pointconv_relu_kernel,
        out_shape=jax.ShapeDtypeStruct((n, c_out, length), x_ncl.dtype),
        grid_spec=pltpu.PrefetchScalarGridSpec(
            num_scalar_prefetch=0,
            grid=grid,
            in_specs=[
                # x tile: kernel sees (C_in, TL); ragged last block is clipped.
                pl.BlockSpec((pl.Squeezed(), c_in, tl), lambda ni, li: (ni, 0, li)),
                # weight / bias: full arrays, resident across the grid.
                pl.BlockSpec((c_out, c_in), lambda ni, li: (0, 0)),
                pl.BlockSpec((c_out, 1), lambda ni, li: (0, 0)),
            ],
            out_specs=pl.BlockSpec((pl.Squeezed(), c_out, tl),
                                   lambda ni, li: (ni, 0, li)),
        ),
        compiler_params=pltpu.CompilerParams(
            dimension_semantics=("parallel", "parallel"),
            vmem_limit_bytes=int(vmem_limit),
        ),
        cost_estimate=pl.CostEstimate(
            flops=flops, transcendentals=0, bytes_accessed=bytes_accessed),
    )(x_ncl, weight, b2d)

    return out


def _reference(x, weight, bias):
    return jnp.maximum(
        jnp.einsum("oc,ncl->nol", weight, x) + bias[None, :, None], 0.0
    )


if __name__ == "__main__":
    key = jax.random.PRNGKey(0)
    k_x, k_w, k_b, k_x2, k_x3 = jax.random.split(key, 5)

    N, C_IN, C_OUT, L = 2, 4, 8, 16

    # Deterministic parameter init, same shapes as nn.Conv1d(C_IN, C_OUT, 1):
    # weight (C_OUT, C_IN, 1) -> squeeze kernel dim, bias (C_OUT,)
    bound = 1.0 / jnp.sqrt(jnp.float32(C_IN))
    weight = jax.random.uniform(k_w, (C_OUT, C_IN), jnp.float32, -bound, bound)
    bias = jax.random.uniform(k_b, (C_OUT,), jnp.float32, -bound, bound)

    # Small shape consistent with the module (full-extent small-L path).
    x = jax.random.normal(k_x, (N, C_IN, L), dtype=jnp.float32)
    out = point_conv_layer(x, weight, bias)
    jax.block_until_ready(out)
    ref = _reference(x, weight, bias)
    assert out.shape == (N, C_OUT, L)
    assert jnp.allclose(out, ref, atol=1e-5, rtol=1e-5)

    # Tiled path with a ragged last block (no wrapper pad/slice): L % 128 != 0.
    L2 = 600
    x2 = jax.random.normal(k_x2, (N, C_IN, L2), dtype=jnp.float32)
    out2 = point_conv_layer(x2, weight, bias)
    jax.block_until_ready(out2)
    ref2 = _reference(x2, weight, bias)
    assert out2.shape == (N, C_OUT, L2)
    assert jnp.allclose(out2, ref2, atol=1e-5, rtol=1e-5)

    # N == 1 path: TL is capped so the length axis still gives >=2 parallel steps.
    L3 = 1024
    x3 = jax.random.normal(k_x3, (1, C_IN, L3), dtype=jnp.float32)
    out3 = point_conv_layer(x3, weight, bias)
    jax.block_until_ready(out3)
    ref3 = _reference(x3, weight, bias)
    assert out3.shape == (1, C_OUT, L3)
    assert jnp.allclose(out3, ref3, atol=1e-5, rtol=1e-5)

    print("KERNEL_OK")
</pallas_src>

<mosaic_0001>
module attributes {stable_mosaic.version = 11 : i64} {
  func.func @_pointconv_relu_kernel(%arg0: i32, %arg1: i32, %arg2: memref<1x4x16xf32, #tpu.memory_space<vmem>>, %arg3: memref<8x4xf32, #tpu.memory_space<vmem>>, %arg4: memref<8x1xf32, #tpu.memory_space<vmem>>, %arg5: memref<1x8x16xf32, #tpu.memory_space<vmem>>) attributes {dimension_semantics = [#tpu.dimension_semantics<parallel>, #tpu.dimension_semantics<parallel>], iteration_bounds = array<i64: 2, 1>, scalar_prefetch = 0 : i64, scratch_operands = 0 : i64, tpu.core_type = #tpu.core_type<tc>, window_params = [{transform_indices = @transform_0, window_bounds = array<i64: 1, 4, 16>}, {pipeline_mode = #tpu.pipeline_mode<synchronous>, transform_indices = @transform_1, window_bounds = array<i64: 8, 4>}, {pipeline_mode = #tpu.pipeline_mode<synchronous>, transform_indices = @transform_2, window_bounds = array<i64: 8, 1>}, {transform_indices = @transform_3, window_bounds = array<i64: 1, 8, 16>}]} {
    %c0 = arith.constant 0 : index
    %c0_0 = arith.constant 0 : index
    %0 = vector.load %arg3[%c0, %c0_0] : memref<8x4xf32, #tpu.memory_space<vmem>>, vector<8x4xf32>
    %c0_1 = arith.constant 0 : index
    %c0_2 = arith.constant 0 : index
    %c0_3 = arith.constant 0 : index
    %1 = vector.load %arg2[%c0_1, %c0_2, %c0_3] : memref<1x4x16xf32, #tpu.memory_space<vmem>>, vector<1x4x16xf32>
    %2 = vector.shape_cast %1 : vector<1x4x16xf32> to vector<4x16xf32>
    %cst = arith.constant dense<0.000000e+00> : vector<8x16xf32>
    %3 = tpu.matmul %0, %2, %cst {dimension_numbers = #tpu.dot_dimension_numbers<[1], [0], [0], [1], [0, 0, 1, 1], [], []>} : vector<8x4xf32>, vector<4x16xf32>, vector<8x16xf32> -> vector<8x16xf32>
    %c0_4 = arith.constant 0 : index
    %c0_5 = arith.constant 0 : index
    %4 = vector.load %arg4[%c0_4, %c0_5] : memref<8x1xf32, #tpu.memory_space<vmem>>, vector<8x1xf32>
    %5 = vector.broadcast %4 : vector<8x1xf32> to vector<8x16xf32>
    %6 = arith.addf %3, %5 : vector<8x16xf32>
    %cst_6 = arith.constant 0.000000e+00 : f32
    %7 = vector.broadcast %cst_6 : f32 to vector<8x16xf32>
    %8 = arith.maximumf %6, %7 : vector<8x16xf32>
    %c0_7 = arith.constant 0 : index
    %c0_8 = arith.constant 0 : index
    %c0_9 = arith.constant 0 : index
    %9 = vector.load %arg5[%c0_7, %c0_8, %c0_9] : memref<1x8x16xf32, #tpu.memory_space<vmem>>, vector<1x8x16xf32>
    %10 = vector.shape_cast %9 : vector<1x8x16xf32> to vector<8x16xf32>
    %11 = vector.shape_cast %8 : vector<8x16xf32> to vector<1x8x16xf32>
    tpu.vector_store %arg5[%c0_7, %c0_8, %c0_9], %11 {strides = array<i32>} : memref<1x8x16xf32, #tpu.memory_space<vmem>>, vector<1x8x16xf32>,
    return
  }
  func.func @transform_0(%arg0: i32, %arg1: i32) -> (i32, i32, i32) {
    %c0_i32 = arith.constant 0 : i32
    %c0_i32_0 = arith.constant 0 : i32
    return %arg0, %c0_i32, %arg1 : i32, i32, i32
  }
  func.func @transform_1(%arg0: i32, %arg1: i32) -> (i32, i32) {
    %c0_i32 = arith.constant 0 : i32
    %c0_i32_0 = arith.constant 0 : i32
    %c0_i32_1 = arith.constant 0 : i32
    return %c0_i32, %c0_i32_0 : i32, i32
  }
  func.func @transform_2(%arg0: i32, %arg1: i32) -> (i32, i32) {
    %c0_i32 = arith.constant 0 : i32
    %c0_i32_0 = arith.constant 0 : i32
    %c0_i32_1 = arith.constant 0 : i32
    return %c0_i32, %c0_i32_0 : i32, i32
  }
  func.func @transform_3(%arg0: i32, %arg1: i32) -> (i32, i32, i32) {
    %c0_i32 = arith.constant 0 : i32
    %c0_i32_0 = arith.constant 0 : i32
    return %arg0, %c0_i32, %arg1 : i32, i32, i32
  }
}

</mosaic_0001>

<bundles_post_ra>
// kernel: tpu_custom_call.1
= control target key start
LH: loop header
LB: loop body
LE: loop exit
PB: predicated region body
PF: predicated region fallthrough
CT: control target
= control target key end

     0   :  { %8 = vsyncpa [#allocation3], 0  ;;  %s592_s0 = inlined_call_operand.vmem [shape: f32[2,4,16], index: 0, kind: input, shape index: {}]   ;;  %s593_s1 = inlined_call_operand.vmem [shape: f32[8,4], index: 1, kind: input, shape index: {}]   ;;  %s594_s2 = inlined_call_operand.vmem [shape: f32[8,1], index: 2, kind: input, shape index: {}]   ;;  %s595_s3 = inlined_call_operand.hbm [shape: f32[2,8,16], index: 3, kind: output, shape index: {}]  }
   0x1   :  { %10 = vsyncpa [#allocation3 + $0x1], 0  ;;  %s489_s12 = smov 0   ;;  %s491_s13 = smov 0  }
   0x2   :  { %s493_s14 = smov 0   ;;  %s495_s15 = smov 0  }
   0x3   :  { %s497_s16 = smov 0   ;;  %s499_s17 = smov 0  }
   0x4 LB: > { %s318_s18 = sadd.s32 4294967295, %s466_s17   ;;  %s319_s19 = sadd.s32 4294967294, %s466_s17   ;;  %s466_s17 = sphi %s499_s17, %s16_s17   ;;  %s462_s16 = sphi %s497_s16, %s602_s16   ;;  %s458_s15 = sphi %s495_s15, %s601_s15   ;;  %s454_s14 = sphi %s493_s14, %s600_s14   ;;  %s450_s13 = sphi %s491_s13, %s599_s13   ;;  %s446_s12 = sphi %s489_s12, %s598_s12  }
   0x5   : > { %s28_s20 = sadd.s32 1, %s462_s16  ;;  %s107_s21 = sadd.s32 1, %s454_s14 }
   0x6   : > { %p30_p0 = scmp.ge.s32.totalorder %s28_s20, 2  ;;  %p117_p1 = scmp.ne.s32.totalorder %s454_s14, %s450_s13 }
   0x7   : > { %p118_p2 = scmp.eq.s32.totalorder %s318_s18, 1  ;;  %p123_p3 = scmp.ne.s32.totalorder %s450_s13, %s446_s12 }
   0x8   : > { %s604_s20 = smov (%p30_p0, %s28_s20), 0  ;;  %p124_p5 = scmp.eq.s32.totalorder %s319_s19, 1 }
   0x9   : > { %p529_p4 = por %p118_p2, %p117_p1  ;;  %s102_s23 = ssub.s32 %s462_s16, %s604_s20 }
   0xa   : > { %p322_p6 = scmp.ge.s32.totalorder %s466_s17, 1  ;;  %p105_p7 = scmp.eq.s32.totalorder %s102_s23, 0 }
   0xb   : > { %p536_p8 = por %p124_p5, %p123_p3  ;;  %p158_p9 = scmp.lt.s32.totalorder %s466_s17, 3 }
   0xc   : > { %s542_s25 = scalar_select %p105_p7, %s454_s14, %s107_s21  }
   0xd   : > { %p159_p10 = pnand %p322_p6, %p158_p9 }
   0xe   : > { %p184_p11 = scmp.lt.s32.totalorder (!%p159_p10), %s458_s15, 1  ;;  %s181_s8 = sand.u32 (!%p159_p10), 1, %s450_s13  }
   0xf   : > { %162 = sbr.rel (%p159_p10) target bundleno = 159 (0x9f), region = 32  ;;  %s323_s9 = sshll.u32 (!%p159_p10), %s181_s8, 3 }
  0x10   : > { %s328_s10 = sshll.u32 (!%p159_p10), %s458_s15, 3  ;;  %s183_s21 = scalar_lea.vmem (!%p159_p10), [#allocation2], %s323_s9 }
  0x11   : > { %s242_s19 = scalar_lea.hbm (!%p159_p10), %s595_s3, %s328_s10  ;;  %s244_s23 = sshll.u32 (!%p159_p10), %s183_s21, 4  ;;  %s245_s23 = int_to_ptr.vmem [resolvable:$true] %s244_s23 }
  0x12   : > { %s246_s26 = sshll.u32 (!%p159_p10), %s242_s19, 4  ;;  %s231_s27 = scalar_lea.sflag (!%p159_p10), [#allocation3], %s181_s8  ;;  %s247_s26 = int_to_ptr.hbm [resolvable:$true] %s246_s26 }
  0x13   : > { %s408_s4 = scalar_lea.hbm (!%p159_p10), %s595_s3, 16 }
  0x14   : > { %v193_v0 = vld [vmem:[%s594_s2] sm:$0xff]  ;;  %v468_v1 = vmov 0   ;;  %s185_s28 = scalar_select %p184_p11, %s458_s15, 1  ;;  %vm203_vm0 = vcmask 1043456   ;;  %vm199_vm1 = vcmask 31744   ;;  %vm228_vm2 = vcmask 130048  }
  0x15   : > { %387 = vset.pattern.permute.xlu0 %v468_v1  ;;  %v191_v2 = vld [vmem:[%s593_s1] sm:$0xff] }
  0x16   : > { %196 = vperm.xlu0 %387, %v193_v0   ;;  %s324_s29 = sshll.u32 %s185_s28, 2  ;;  %s402_s28 = sshra.s32 %s247_s26, 4  ;;  %s403_s28 = int_to_ptr.hbm [resolvable:$true] %s402_s28 }
  0x17   : > { %s190_s5 = scalar_lea.vmem %s592_s0, %s324_s29  ;;  %s404_s15 = scalar_lea.hbm %s403_s28, 8 }
  0x18   : > { %v192_v3 = vld [vmem:[%s190_s5] sm:$0xf]  ;;  %p405_p12 = scmp.ne.s32.totalorder %s403_s28, %s404_s15  ;;  %p409_p1 = scmp.lt.s32.totalorder %s403_s28, %s595_s3 }
  0x19   : > { %325 = vmatpush.msk.msra.mxu0 %vm203_vm0, %v192_v3  ;;  %p410_p2 = scmp.lt.s32.totalorder %s408_s4, %s404_s15 }
  0x1a   : > { %326 = vmatmul.msk.f32.vlgmr.msra.gmra.mxu0 %vm199_vm1, %v191_v2  ;;  %p406_p13 = pnand %p405_p12, %p529_p4 }
  0x1b   : > { %p411_p3 = por %p410_p2, %p409_p1 }
  0x1c   : > { %p407_p0 = pneg %p406_p13 }
  0x1e   : > { %p412_p5 = pnand %p411_p3, %p407_p0 }
  0x88   : > { %v197_v4 = vpop.permute.xlu0 %196 }
  0x97   : > { %v224_v5 = vpop.f32.mrf.mxu0 }
  0x98   : > { %v225_v6 = vadd.f32 %v224_v5, %v197_v4 }
  0x9a   : > { %v227_v7 = vmax.f32 %v225_v6, 0.0 }
  0x9c   : > { %229 = vst.msk [vmem:[%s183_s21] sm:$0xff] %vm228_vm2, %v227_v7 }
  0x9d   : > { %415 = shalt.err (!%p412_p5)
}
  0x9e   : > { %331 = dma.vmem_to_hbm [thread:$0]  (%p529_p4), %s245_s23, 128, %s247_s26, %s231_s27  }
  0x9f PF: > { %p337_p6 = scmp.ge.s32.totalorder %s466_s17, 2  ;;  %s258_s7 = sand.u32 1, %s446_s12  }
  0xa0   : > { %s259_s8 = scalar_lea.sflag [#allocation3], %s258_s7 }
  0xa1   : > { %p334_p7 = pnand %p337_p6, %p536_p8 }
  0xa3   : > { %p335_p9 = pneg %p334_p7 }
  0xa5   : > { %441 = dma.done.wait (%p335_p9), %s259_s8, 128  }
  0xa6   : > { %443 = vsyncadd (%p335_p9), %s259_s8, 4294967168  ;;  %s16_s17 = sadd.s32 1, %s466_s17   ;;  %s598_s12 = smov %s450_s13 }
  0xa7   : > { %p13_p10 = scmp.ge.s32.totalorder %s16_s17, 4   ;;  %s599_s13 = smov %s454_s14 }
  0xa8   : > { %s600_s14 = smov %s542_s25  ;;  %s601_s15 = smov %s462_s16 }
  0xa9   : > { %s602_s16 = smov %s604_s20  ;;  %15 = sbr.rel (!%p13_p10) target bundleno = 4 (0x4), region = 67 }
  0xae   :  { %265 = vsyncpa [#allocation3], 1 }
  0xaf   :  { %267 = vsyncpa [#allocation3 + $0x1], 1 }

</bundles_post_ra>
